<compile_context>
chip_gen: v6e
topology: v6e:2x2x1
jax: 0.10.0
libtpu: 0.0.40
codegen_flags: <defaults>
</compile_context>

<pallas_src>
import math
from functools import partial

import jax
import jax.numpy as jnp
from jax import lax
from jax.experimental import pallas as pl
from jax.experimental.pallas import tpu as pltpu

_NEG_INF = -1e9


# ---------------------------------------------------------------------------
# helpers
# ---------------------------------------------------------------------------
def _gelu(x):
    # matches the torch tanh-approx gelu in the reference module
    return 0.5 * x * (1.0 + jnp.tanh(math.sqrt(2.0 / math.pi) * (x + 0.044715 * x * x * x)))


def _layernorm(x, g, b, e=1e-5):
    # OpenAI-style layernorm (epsilon inside sqrt), mean/var over last dim.
    # rsqrt goes to the EUP slot instead of a vector divide.
    u = jnp.mean(x, axis=-1, keepdims=True)
    s = jnp.mean((x - u) ** 2, axis=-1, keepdims=True)
    return g * ((x - u) * lax.rsqrt(s + e)) + b


def _seq_tile(s, target=256):
    """Sequence tile that is either a multiple of 128 or the full extent."""
    for t in (target, 128):
        if s > t and s % t == 0:
            return t
    return s


def _vmem_cap_bytes():
    """~85% of physical VMEM for this chip generation (64 MiB fallback)."""
    cap = None
    try:
        info = pltpu.get_tpu_info()
        cap = getattr(info, "vmem_capacity_bytes", None)
    except Exception:
        cap = None
    if not cap:
        cap = 64 << 20          # conservative: fits every generation incl. v7x
    return int(int(cap) * 0.85)


def _vmem_limit_bytes(block_bytes, scratch_bytes=0):
    # double-buffered blocks + scratch + headroom, clamped to the physical cap
    need = 2 * int(block_bytes) + int(scratch_bytes) + (8 << 20)
    return int(min(max(need, 32 << 20), _vmem_cap_bytes()))


# ---------------------------------------------------------------------------
# embedding + sum(dim=2) kernel  (counts one-hot -> single matmul)
# ---------------------------------------------------------------------------
def embed_sum_kernel(x_ref, emb_ref, o_ref, *, n_codes):
    # x_ref: (1, tS, K) int32, emb_ref: (V, E) bf16, o_ref: (1, tS, E) f32
    tS = x_ref.shape[1]
    V = emb_ref.shape[0]
    iota_v = lax.broadcasted_iota(jnp.int32, (tS, V), 1)
    # counts[s, v] = #codes k with x[s, k] == v ; one (tS,V)x(V,E) matmul total.
    # Loop over the (small) K axis avoids a (tS, K, V) intermediate.
    counts = jnp.zeros((tS, V), jnp.float32)
    for kk in range(n_codes):
        counts = counts + (x_ref[0, :, kk:kk + 1] == iota_v).astype(jnp.float32)
    # NOTE: out-of-range indices silently contribute a zero row (no gather error).
    o_ref[0] = jnp.dot(counts.astype(emb_ref.dtype), emb_ref[...],
                       preferred_element_type=jnp.float32)


def embed_sum(x, emb):
    B, S, K = x.shape
    V, E = emb.shape
    tS = _seq_tile(S)
    nS = S // tS
    blk = tS * K * 4 + V * E * emb.dtype.itemsize + tS * E * 4
    scr = tS * V * 4            # one-hot counts temporary
    return pl.pallas_call(
        partial(embed_sum_kernel, n_codes=K),
        out_shape=jax.ShapeDtypeStruct((B, S, E), jnp.float32),
        grid=(B, nS),
        in_specs=[
            pl.BlockSpec((1, tS, K), lambda b, s: (b, s, 0)),
            pl.BlockSpec((V, E), lambda b, s: (0, 0)),
        ],
        out_specs=pl.BlockSpec((1, tS, E), lambda b, s: (b, s, 0)),
        compiler_params=pltpu.CompilerParams(
            dimension_semantics=("parallel", "parallel"),
            vmem_limit_bytes=_vmem_limit_bytes(blk, scr)),
    )(x, emb)


# ---------------------------------------------------------------------------
# kernel 1: K/V projection, emits key / value in final head layouts (bf16)
# ---------------------------------------------------------------------------
def kv_proj_kernel(h_ref, w_ref, b_ref, k_ref, v_ref, *, n_head):
    # h_ref: (1, tS, E) f32; w_ref: (E, 2E) bf16; b_ref: (1, 2E) f32
    # k_ref: (1, H, D, tS) bf16 (lane-dense last dim); v_ref: (1, H, tS, D) bf16
    x = h_ref[0]
    tS, E = x.shape
    D = E // n_head
    kv = jnp.dot(x.astype(w_ref.dtype), w_ref[...],
                 preferred_element_type=jnp.float32) + b_ref[...]
    k = kv[:, :E].reshape(tS, n_head, D)
    v = kv[:, E:].reshape(tS, n_head, D)
    # split_heads(k=True):  (tS, H, D) -> (H, D, tS)
    k_ref[0] = jnp.transpose(k, (1, 2, 0)).astype(k_ref.dtype)
    # split_heads(k=False): (tS, H, D) -> (H, tS, D)
    # TODO(synk): last dim D is lane-sparse when D < 128; kept to match the
    #             torch cache layout returned by the module.
    v_ref[0] = jnp.transpose(v, (1, 0, 2)).astype(v_ref.dtype)


# ---------------------------------------------------------------------------
# kernel 2: Q projection (in-kernel) + flash attention + c_proj + ln_1
# ---------------------------------------------------------------------------
def attn_kernel(h_ref, k_ref, v_ref, wq_ref, bq_ref, wproj_ref, bproj_ref,
                g1_ref, b1_ref, n_ref, q_sc, m_sc, l_sc, acc_sc,
                *, n_head, tq, tkv):
    qi = pl.program_id(1)
    kv = pl.program_id(2)
    nkv = pl.num_programs(2)

    @pl.when(kv == 0)
    def _():
        # Q projection once per (batch, q-tile); softmax scale folded in here.
        x = h_ref[0]                                   # (tq, E) f32
        E = x.shape[-1]
        D = E // n_head
        q = jnp.dot(x.astype(wq_ref.dtype), wq_ref[...],
                    preferred_element_type=jnp.float32) + bq_ref[...]
        q = q * (1.0 / math.sqrt(D))                   # scale=True in reference
        q_sc[...] = jnp.transpose(q.reshape(tq, n_head, D), (1, 0, 2)).astype(q_sc.dtype)
        m_sc[...] = jnp.full(m_sc.shape, -jnp.inf, m_sc.dtype)
        l_sc[...] = jnp.zeros(l_sc.shape, l_sc.dtype)
        acc_sc[...] = jnp.zeros(acc_sc.shape, acc_sc.dtype)

    def update(masked):
        q = q_sc[...]                                  # (H, tq, D) bf16
        k = k_ref[0]                                   # (H, D, tkv) bf16
        v = v_ref[0]                                   # (H, tkv, D) bf16
        # all heads in one batched MXU call: (H, tq, tkv)
        s = jnp.einsum('hqd,hdk->hqk', q, k, preferred_element_type=jnp.float32)
        if masked:
            # diagonal tile only (tq == tkv -> local indices suffice);
            # matches torch w*b + (-1e9)*(1-b).
            row = lax.broadcasted_iota(jnp.int32, (1, tq, tkv), 1)
            col = lax.broadcasted_iota(jnp.int32, (1, tq, tkv), 2)
            s = jnp.where(col <= row, s, _NEG_INF)
        m_prev = m_sc[...]
        m_new = jnp.maximum(m_prev, jnp.max(s, axis=-1, keepdims=True))
        alpha = jnp.exp(m_prev - m_new)
        p = jnp.exp(s - m_new)
        l_sc[...] = alpha * l_sc[...] + jnp.sum(p, axis=-1, keepdims=True)
        acc_sc[...] = alpha * acc_sc[...] + jnp.einsum(
            'hqk,hkd->hqd', p.astype(v.dtype), v,
            preferred_element_type=jnp.float32)
        m_sc[...] = m_new

    # KV tiles strictly below the diagonal: no mask work at all.
    @pl.when(kv < qi)
    def _():
        update(masked=False)

    # Diagonal tile: apply the causal mask. (kv > qi tiles are fully skipped
    # and, thanks to the clamped index_map, not even DMA'd.)
    @pl.when(kv == qi)
    def _():
        update(masked=True)

    @pl.when(kv == nkv - 1)
    def _():
        # exact reciprocal over the small (H, tq, 1) tensor, then broadcast mul
        a = acc_sc[...] * pl.reciprocal(l_sc[...], approx=False)   # (H, tq, D)
        D = a.shape[-1]
        merged = jnp.transpose(a, (1, 0, 2)).reshape(tq, n_head * D)  # merge_heads
        a_proj = jnp.dot(merged.astype(wproj_ref.dtype), wproj_ref[...],
                         preferred_element_type=jnp.float32) + bproj_ref[...]
        n_ref[0] = _layernorm(h_ref[0] + a_proj, g1_ref[...], b1_ref[...])


# ---------------------------------------------------------------------------
# kernel 3: MLP (gelu) + residual + ln_2
# ---------------------------------------------------------------------------
def mlp_kernel(n_ref, wfc_ref, bfc_ref, wp2_ref, bp2_ref, g2_ref, b2_ref, o_ref):
    n = n_ref[0]                                   # (tS, E) f32
    hmid = jnp.dot(n.astype(wfc_ref.dtype), wfc_ref[...],
                   preferred_element_type=jnp.float32) + bfc_ref[...]
    hmid = _gelu(hmid)                             # f32 elementwise
    m = jnp.dot(hmid.astype(wp2_ref.dtype), wp2_ref[...],
                preferred_element_type=jnp.float32) + bp2_ref[...]
    o_ref[0] = _layernorm(n + m, g2_ref[...], b2_ref[...])


# ---------------------------------------------------------------------------
# one transformer Block
# ---------------------------------------------------------------------------
def block_forward(h, p, n_head):
    B, S, E = h.shape
    D = E // n_head
    F = p["w_fc"].shape[1]          # 4*E
    wbytes = p["w_kv"].dtype.itemsize

    tS = _seq_tile(S)
    nS = S // tS
    tq = tkv = tS
    nQ, nKV = S // tq, S // tkv

    # ---- 1) K/V projection -> key/value in head layouts (bf16) ---------------
    kv_blk = (tS * E * 4 + E * 2 * E * wbytes + 2 * E * 4
              + 2 * n_head * tS * D * 2)
    key, value = pl.pallas_call(
        partial(kv_proj_kernel, n_head=n_head),
        out_shape=(jax.ShapeDtypeStruct((B, n_head, D, S), jnp.bfloat16),
                   jax.ShapeDtypeStruct((B, n_head, S, D), jnp.bfloat16)),
        grid=(B, nS),
        in_specs=[
            pl.BlockSpec((1, tS, E), lambda b, s: (b, s, 0)),
            pl.BlockSpec((E, 2 * E), lambda b, s: (0, 0)),
            pl.BlockSpec((1, 2 * E), lambda b, s: (0, 0)),
        ],
        out_specs=(
            pl.BlockSpec((1, n_head, D, tS), lambda b, s: (b, 0, 0, s)),
            pl.BlockSpec((1, n_head, tS, D), lambda b, s: (b, 0, s, 0)),
        ),
        compiler_params=pltpu.CompilerParams(
            dimension_semantics=("parallel", "parallel"),
            vmem_limit_bytes=_vmem_limit_bytes(kv_blk)),
    )(h, p["w_kv"], p["b_kv"])

    # ---- 2) streaming attention (Q computed in-kernel) + c_proj + ln_1 --------
    # KV tiles past the causal diagonal are clamped to the diagonal block index
    # so the pipeline reuses the resident buffer instead of re-DMAing them.
    attn_blk = (tq * E * 4
                + n_head * D * tkv * 2 + n_head * tkv * D * 2
                + 2 * E * E * wbytes + 5 * E * 4
                + tq * E * 4)
    attn_scr = (n_head * tq * D * 2 + 2 * n_head * tq * 4
                + n_head * tq * D * 4
                + 2 * n_head * tq * tkv * 4)      # s / p temporaries
    n_state = pl.pallas_call(
        partial(attn_kernel, n_head=n_head, tq=tq, tkv=tkv),
        out_shape=jax.ShapeDtypeStruct((B, S, E), jnp.float32),
        grid=(B, nQ, nKV),
        in_specs=[
            pl.BlockSpec((1, tq, E), lambda b, q, kv: (b, q, 0)),
            pl.BlockSpec((1, n_head, D, tkv),
                         lambda b, q, kv: (b, 0, 0, jnp.minimum(kv, q))),
            pl.BlockSpec((1, n_head, tkv, D),
                         lambda b, q, kv: (b, 0, jnp.minimum(kv, q), 0)),
            pl.BlockSpec((E, E), lambda b, q, kv: (0, 0)),
            pl.BlockSpec((1, E), lambda b, q, kv: (0, 0)),
            pl.BlockSpec((E, E), lambda b, q, kv: (0, 0)),
            pl.BlockSpec((1, E), lambda b, q, kv: (0, 0)),
            pl.BlockSpec((1, E), lambda b, q, kv: (0, 0)),
            pl.BlockSpec((1, E), lambda b, q, kv: (0, 0)),
        ],
        out_specs=pl.BlockSpec((1, tq, E), lambda b, q, kv: (b, q, 0)),
        scratch_shapes=[pltpu.VMEM((n_head, tq, D), jnp.bfloat16),   # q
                        pltpu.VMEM((n_head, tq, 1), jnp.float32),    # m
                        pltpu.VMEM((n_head, tq, 1), jnp.float32),    # l
                        pltpu.VMEM((n_head, tq, D), jnp.float32)],   # acc
        compiler_params=pltpu.CompilerParams(
            dimension_semantics=("parallel", "parallel", "arbitrary"),
            vmem_limit_bytes=_vmem_limit_bytes(attn_blk, attn_scr)),
    )(h, key, value, p["w_q"], p["b_q"], p["w_proj"], p["b_proj"],
      p["g1"], p["b1"])

    # ---- 3) MLP + ln_2 ---------------------------------------------------------
    mlp_blk = (tS * E * 4 + E * F * wbytes + F * 4 + F * E * wbytes
               + 3 * E * 4 + tS * E * 4)
    mlp_scr = tS * F * 4                           # gelu intermediate
    h_out = pl.pallas_call(
        mlp_kernel,
        out_shape=jax.ShapeDtypeStruct((B, S, E), jnp.float32),
        grid=(B, nS),
        in_specs=[
            pl.BlockSpec((1, tS, E), lambda b, s: (b, s, 0)),
            pl.BlockSpec((E, F), lambda b, s: (0, 0)),
            pl.BlockSpec((1, F), lambda b, s: (0, 0)),
            pl.BlockSpec((F, E), lambda b, s: (0, 0)),
            pl.BlockSpec((1, E), lambda b, s: (0, 0)),
            pl.BlockSpec((1, E), lambda b, s: (0, 0)),
            pl.BlockSpec((1, E), lambda b, s: (0, 0)),
        ],
        out_specs=pl.BlockSpec((1, tS, E), lambda b, s: (b, s, 0)),
        compiler_params=pltpu.CompilerParams(
            dimension_semantics=("parallel", "parallel"),
            vmem_limit_bytes=_vmem_limit_bytes(mlp_blk, mlp_scr)),
    )(n_state, p["w_fc"], p["b_fc"], p["w_p2"], p["b_p2"], p["g2"], p["b2"])

    return h_out, key, value


# ---------------------------------------------------------------------------
# full TransformerModel forward (pre_sts=None path)
# ---------------------------------------------------------------------------
def transformer_forward(x, params, n_head):
    h = embed_sum(x, params["embed"])
    sts = [h]
    for layer_p in params["layers"]:
        h, k, v = block_forward(h, layer_p, n_head)
        sts.append((h, k, v))
    return sts


# ---------------------------------------------------------------------------
# parameter init (f32, matching module __init__) + TPU cast / split
# ---------------------------------------------------------------------------
def init_params(key, n_indexs, n_embd, n_layer):
    keys = jax.random.split(key, 1 + 4 * n_layer)
    params = {"embed": 0.02 * jax.random.normal(keys[0], (n_indexs, n_embd), jnp.float32),
              "layers": []}
    f = 4 * n_embd
    for i in range(n_layer):
        k0, k1, k2, k3 = keys[1 + 4 * i: 1 + 4 * (i + 1)]
        params["layers"].append({
            "w_attn": 0.02 * jax.random.normal(k0, (n_embd, 3 * n_embd), jnp.float32),
            "b_attn": jnp.zeros((1, 3 * n_embd), jnp.float32),
            "w_proj": 0.02 * jax.random.normal(k1, (n_embd, n_embd), jnp.float32),
            "b_proj": jnp.zeros((1, n_embd), jnp.float32),
            "g1": jnp.ones((1, n_embd), jnp.float32),
            "b1": jnp.zeros((1, n_embd), jnp.float32),
            "w_fc": 0.02 * jax.random.normal(k2, (n_embd, f), jnp.float32),
            "b_fc": jnp.zeros((1, f), jnp.float32),
            "w_p2": 0.02 * jax.random.normal(k3, (f, n_embd), jnp.float32),
            "b_p2": jnp.zeros((1, n_embd), jnp.float32),
            "g2": jnp.ones((1, n_embd), jnp.float32),
            "b2": jnp.zeros((1, n_embd), jnp.float32),
        })
    return params


def cast_params_for_tpu(params):
    """Cast matmul weights to bf16 once (MXU inputs) and split the fused c_attn
    weight into Q (consumed inside the attention kernel) and KV parts.
    Biases / LN parameters stay f32."""
    out = {"embed": params["embed"].astype(jnp.bfloat16), "layers": []}
    for lp in params["layers"]:
        E = lp["w_attn"].shape[0]
        out["layers"].append({
            "w_q": lp["w_attn"][:, :E].astype(jnp.bfloat16),
            "b_q": lp["b_attn"][:, :E],
            "w_kv": lp["w_attn"][:, E:].astype(jnp.bfloat16),
            "b_kv": lp["b_attn"][:, E:],
            "w_proj": lp["w_proj"].astype(jnp.bfloat16),
            "b_proj": lp["b_proj"],
            "g1": lp["g1"], "b1": lp["b1"],
            "w_fc": lp["w_fc"].astype(jnp.bfloat16),
            "b_fc": lp["b_fc"],
            "w_p2": lp["w_p2"].astype(jnp.bfloat16),
            "b_p2": lp["b_p2"],
            "g2": lp["g2"], "b2": lp["b2"],
        })
    return out


if __name__ == "__main__":
    # small config consistent with the module: cfg.n_embd=32, cfg.n_head=4,
    # cfg.n_layer=2, n_ctx=8, n_indexs=50, x is a [B, S, K] index tensor.
    B, S, K = 2, 8, 3
    V, E, H, L = 50, 32, 4, 2

    root = jax.random.PRNGKey(0)
    k_param, k_x = jax.random.split(root)
    params = cast_params_for_tpu(init_params(k_param, V, E, L))
    x = jax.random.randint(k_x, (B, S, K), 0, V, dtype=jnp.int32)

    sts = transformer_forward(x, params, n_head=H)
    jax.block_until_ready(sts)

    # light sanity checks on shapes
    assert sts[0].shape == (B, S, E)
    for (h_i, k_i, v_i) in sts[1:]:
        assert h_i.shape == (B, S, E)
        assert k_i.shape == (B, H, E // H, S) and k_i.dtype == jnp.bfloat16
        assert v_i.shape == (B, H, S, E // H) and v_i.dtype == jnp.bfloat16

    print("KERNEL_OK")
</pallas_src>

<mosaic_0001>
module attributes {stable_mosaic.version = 11 : i64} {
  func.func @embed_sum_kernel(%arg0: i32, %arg1: i32, %arg2: memref<1x8x3xi32, #tpu.memory_space<vmem>>, %arg3: memref<50x32xbf16, #tpu.memory_space<vmem>>, %arg4: memref<1x8x32xf32, #tpu.memory_space<vmem>>) attributes {dimension_semantics = [#tpu.dimension_semantics<parallel>, #tpu.dimension_semantics<parallel>], iteration_bounds = array<i64: 2, 1>, scalar_prefetch = 0 : i64, scratch_operands = 0 : i64, tpu.core_type = #tpu.core_type<tc>, window_params = [{transform_indices = @transform_0, window_bounds = array<i64: 1, 8, 3>}, {pipeline_mode = #tpu.pipeline_mode<synchronous>, transform_indices = @transform_1, window_bounds = array<i64: 50, 32>}, {transform_indices = @transform_2, window_bounds = array<i64: 1, 8, 32>}]} {
    %0 = tpu.iota {dimensions = array<i32: 1>} : vector<8x50xi32>
    %cst = arith.constant 0.000000e+00 : f32
    %1 = vector.broadcast %cst : f32 to vector<8x50xf32>
    %c0 = arith.constant 0 : index
    %c0_0 = arith.constant 0 : index
    %c0_1 = arith.constant 0 : index
    %2 = vector.load %arg2[%c0, %c0_0, %c0_1] : memref<1x8x3xi32, #tpu.memory_space<vmem>>, vector<1x8x1xi32>
    %3 = vector.shape_cast %2 : vector<1x8x1xi32> to vector<8x1xi32>
    %4 = vector.broadcast %3 : vector<8x1xi32> to vector<8x50xi32>
    %5 = arith.cmpi eq, %4, %0 : vector<8x50xi32>
    %6 = arith.extui %5 : vector<8x50xi1> to vector<8x50xi32>
    %7 = arith.sitofp %6 : vector<8x50xi32> to vector<8x50xf32>
    %8 = arith.addf %1, %7 : vector<8x50xf32>
    %c0_2 = arith.constant 0 : index
    %c0_3 = arith.constant 0 : index
    %c1 = arith.constant 1 : index
    %9 = vector.load %arg2[%c0_2, %c0_3, %c1] : memref<1x8x3xi32, #tpu.memory_space<vmem>>, vector<1x8x1xi32>
    %10 = vector.shape_cast %9 : vector<1x8x1xi32> to vector<8x1xi32>
    %11 = vector.broadcast %10 : vector<8x1xi32> to vector<8x50xi32>
    %12 = arith.cmpi eq, %11, %0 : vector<8x50xi32>
    %13 = arith.extui %12 : vector<8x50xi1> to vector<8x50xi32>
    %14 = arith.sitofp %13 : vector<8x50xi32> to vector<8x50xf32>
    %15 = arith.addf %8, %14 : vector<8x50xf32>
    %c0_4 = arith.constant 0 : index
    %c0_5 = arith.constant 0 : index
    %c2 = arith.constant 2 : index
    %16 = vector.load %arg2[%c0_4, %c0_5, %c2] : memref<1x8x3xi32, #tpu.memory_space<vmem>>, vector<1x8x1xi32>
    %17 = vector.shape_cast %16 : vector<1x8x1xi32> to vector<8x1xi32>
    %18 = vector.broadcast %17 : vector<8x1xi32> to vector<8x50xi32>
    %19 = arith.cmpi eq, %18, %0 : vector<8x50xi32>
    %20 = arith.extui %19 : vector<8x50xi1> to vector<8x50xi32>
    %21 = arith.sitofp %20 : vector<8x50xi32> to vector<8x50xf32>
    %22 = arith.addf %15, %21 : vector<8x50xf32>
    %23 = arith.truncf %22 : vector<8x50xf32> to vector<8x50xbf16>
    %c0_6 = arith.constant 0 : index
    %c0_7 = arith.constant 0 : index
    %24 = vector.load %arg3[%c0_6, %c0_7] : memref<50x32xbf16, #tpu.memory_space<vmem>>, vector<50x32xbf16>
    %cst_8 = arith.constant dense<0.000000e+00> : vector<8x32xf32>
    %25 = tpu.matmul %23, %24, %cst_8 {dimension_numbers = #tpu.dot_dimension_numbers<[1], [0], [0], [1], [0, 0, 1, 1], [], []>} : vector<8x50xbf16>, vector<50x32xbf16>, vector<8x32xf32> -> vector<8x32xf32>
    %c0_9 = arith.constant 0 : index
    %c0_10 = arith.constant 0 : index
    %c0_11 = arith.constant 0 : index
    %26 = vector.load %arg4[%c0_9, %c0_10, %c0_11] : memref<1x8x32xf32, #tpu.memory_space<vmem>>, vector<1x8x32xf32>
    %27 = vector.shape_cast %26 : vector<1x8x32xf32> to vector<8x32xf32>
    %28 = vector.shape_cast %25 : vector<8x32xf32> to vector<1x8x32xf32>
    tpu.vector_store %arg4[%c0_9, %c0_10, %c0_11], %28 {strides = array<i32>} : memref<1x8x32xf32, #tpu.memory_space<vmem>>, vector<1x8x32xf32>,
    return
  }
  func.func @transform_0(%arg0: i32, %arg1: i32) -> (i32, i32, i32) {
    %c0_i32 = arith.constant 0 : i32
    %c0_i32_0 = arith.constant 0 : i32
    return %arg0, %arg1, %c0_i32 : i32, i32, i32
  }
  func.func @transform_1(%arg0: i32, %arg1: i32) -> (i32, i32) {
    %c0_i32 = arith.constant 0 : i32
    %c0_i32_0 = arith.constant 0 : i32
    %c0_i32_1 = arith.constant 0 : i32
    return %c0_i32, %c0_i32_0 : i32, i32
  }
  func.func @transform_2(%arg0: i32, %arg1: i32) -> (i32, i32, i32) {
    %c0_i32 = arith.constant 0 : i32
    %c0_i32_0 = arith.constant 0 : i32
    return %arg0, %arg1, %c0_i32 : i32, i32, i32
  }
}

</mosaic_0001>

<bundles_post_ra>
// kernel: tpu_custom_call.1
= control target key start
LH: loop header
LB: loop body
LE: loop exit
PB: predicated region body
PF: predicated region fallthrough
CT: control target
= control target key end

     0   :  { %7 = vsyncpa [#allocation3], 0  ;;  %s680_s0 = inlined_call_operand.vmem [shape: s32[2,8,3], index: 0, kind: input, shape index: {}]   ;;  %s681_s1 = inlined_call_operand.vmem [shape: bf16[50,32], index: 1, kind: input, shape index: {}]   ;;  %s682_s2 = inlined_call_operand.hbm [shape: f32[2,8,32], index: 2, kind: output, shape index: {}]  }
   0x1   :  { %9 = vsyncpa [#allocation3 + $0x1], 0  ;;  %s557_s9 = smov 0   ;;  %s559_s10 = smov 0  }
   0x2   :  { %s561_s11 = smov 0   ;;  %s563_s12 = smov 0  }
   0x3   :  { %s565_s13 = smov 0   ;;  %s567_s14 = smov 0  }
   0x4 LB: > { %s354_s15 = sadd.s32 4294967295, %s534_s14   ;;  %s355_s16 = sadd.s32 4294967294, %s534_s14   ;;  %s534_s14 = sphi %s567_s14, %s15_s14   ;;  %s530_s13 = sphi %s565_s13, %s689_s13   ;;  %s526_s12 = sphi %s563_s12, %s688_s12   ;;  %s522_s11 = sphi %s561_s11, %s687_s11   ;;  %s518_s10 = sphi %s559_s10, %s686_s10   ;;  %s514_s9 = sphi %s557_s9, %s685_s9  }
   0x5   : > { %s27_s17 = sadd.s32 1, %s530_s13  ;;  %s85_s18 = sadd.s32 1, %s522_s11 }
   0x6   : > { %p29_p0 = scmp.ge.s32.totalorder %s27_s17, 2  ;;  %p95_p1 = scmp.ne.s32.totalorder %s522_s11, %s518_s10 }
   0x7   : > { %p96_p2 = scmp.eq.s32.totalorder %s354_s15, 1  ;;  %p101_p3 = scmp.ne.s32.totalorder %s518_s10, %s514_s9 }
   0x8   : > { %s691_s17 = smov (%p29_p0, %s27_s17), 0  ;;  %p102_p5 = scmp.eq.s32.totalorder %s355_s16, 1 }
   0x9   : > { %p597_p4 = por %p96_p2, %p95_p1  ;;  %s80_s20 = ssub.s32 %s530_s13, %s691_s17 }
   0xa   : > { %p358_p6 = scmp.ge.s32.totalorder %s534_s14, 1  ;;  %p83_p7 = scmp.eq.s32.totalorder %s80_s20, 0 }
   0xb   : > { %p604_p8 = por %p102_p5, %p101_p3  ;;  %p133_p9 = scmp.lt.s32.totalorder %s534_s14, 3 }
   0xc   : > { %s610_s22 = scalar_select %p83_p7, %s522_s11, %s85_s18  }
   0xd   : > { %p134_p10 = pnand %p358_p6, %p133_p9 }
   0xe   : > { %p157_p11 = scmp.lt.s32.totalorder (!%p134_p10), %s526_s12, 1  ;;  %s154_s8 = sand.u32 (!%p134_p10), 1, %s518_s10  }
   0xf   : > { %137 = sbr.rel (%p134_p10) target bundleno = 372 (0x174), region = 28  ;;  %s359_s15 = sshll.u32 (!%p134_p10), %s154_s8, 3 }
  0x10   : > { %s370_s16 = sshll.u32 (!%p134_p10), %s526_s12, 7  ;;  %s156_s18 = scalar_lea.vmem (!%p134_p10), [#allocation2], %s359_s15 }
  0x11   : > { %s283_s20 = sshll.u32 (!%p134_p10), %s156_s18, 4  ;;  %s636_s20 = int_to_ptr.vmem [resolvable:$true] %s283_s20 }
  0x12   : > { %s458_s27 = scalar_lea.vmem (!%p134_p10), %s636_s20, 128 }
  0x13   : > { %p459_p12 = scmp.ne.s32.totalorder (!%p134_p10), %s636_s20, %s458_s27 }
  0x14   : > { %v536_v0 = vmov 0   ;;  %v537_v1 = vmov 2   ;;  %v454_v2 = vld [vmem:[%s681_s1 + $0x18] ss:$0 sps:$4 sm:$0x11]   ;;  %vm222_vm0 = vcmask 1040384   ;;  %v165_v10 = vlaneseq }
  0x15   : > { %450 = vset.pattern.permute.xlu0 %v536_v0  ;;  %452 = vset.pattern.permute.xlu1 %v537_v1  ;;  %s158_s25 = scalar_select %p157_p11, %s526_s12, 1  ;;  %v538_v3 = vmov 0.0   ;;  %v224_v4 = vsel %vm222_vm0, %v454_v2, 0  ;;  %v455_v5 = vld [vmem:[%s681_s1 + $0x10] sm:$0xff]   ;;  %v456_v7 = vld [vmem:[%s681_s1 + $0x8] sm:$0xff]   ;;  %v539_v8 = vmov 1  }
  0x16   : > { %378 = vmatprep.subr.bf16.mxu0 %v538_v3  ;;  %v457_v9 = vld [vmem:[%s681_s1] sm:$0xff]   ;;  %vm540_vm1 = vmmov 0   ;;  %v166_v11 = vand.u32 127, %v165_v10  ;;  %vm218_vm5 = vcmask 408576   ;;  %vm266_vm6 = vcmask 261120   ;;  %p460_p13 = pnand %p459_p12, %p597_p4  ;;  %s541_s12 = smov [#allocation2]  }
  0x17   : > { %s360_s26 = sshll.u32 %s158_s25, 3  ;;  %379 = vmatpush3.bf16.msra.mxu0 %v224_v4  ;;  %386 = vmatprep.mubr.msk.bf16.mxu0 %vm540_vm1, %v538_v3  ;;  %s634_s25 = scalar_lea.hbm %s682_s2, %s370_s16 }
  0x18   : > { %s163_s3 = scalar_lea.vmem %s680_s0, %s360_s26  ;;  %380 = vmatprep.subr.bf16.mxu0 %v538_v3  ;;  %s269_s26 = scalar_lea.sflag [#allocation3], %s154_s8 }
  0x19   : > { %v167_v6 = vld [vmem:[%s163_s3] sm:$0xff]  ;;  %p461_p0 = pneg %p460_p13  ;;  %s462_s28 = sshll.u32 %s541_s12, 4  ;;  %s463_s28 = int_to_ptr.vmem [resolvable:$false] %s462_s28 }
  0x1a   : > { %169 = vperm.xlu0 %450, %v167_v6   ;;  %183 = vperm.xlu1 %452, %v167_v6   ;;  %s464_s29 = scalar_lea.vmem %s463_s28, 256  ;;  %p465_p1 = scmp.lt.s32.totalorder %s636_s20, %s463_s28 }
  0x1b   : > { %381 = vmatpush3.bf16.msra.mxu0 %v455_v5  ;;  %p466_p2 = scmp.lt.s32.totalorder %s464_s29, %s458_s27 }
  0x1c   : > { %382 = vmatprep.subr.bf16.mxu0 %v538_v3 }
  0x1d   : > { %p467_p3 = por %p466_p2, %p465_p1 }
  0x1e   : > { %451 = vset.pattern.permute.xlu0 %v539_v8 }
  0x1f   : > { %176 = vperm.xlu0 %451, %v167_v6   ;;  %383 = vmatpush3.bf16.msra.mxu0 %v456_v7  ;;  %p468_p5 = pnand %p467_p3, %p461_p0 }
  0x20   : > { %384 = vmatprep.subr.bf16.mxu0 %v538_v3 }
  0x23   : > { %385 = vmatpush3.bf16.msra.mxu0 %v457_v9  ;;  %453 = vset.pattern.permute.xlu0 %v537_v1 }
  0x95   : > { %v170_v12 = vpop.permute.xlu0 %169  ;;  %v184_v13 = vpop.permute.xlu1 %183 }
  0x96   : > { %vm171_vm2 = vcmp.eq.s32.totalorder %v170_v12, %v166_v11  ;;  %vm185_vm3 = vcmp.eq.s32.totalorder %v184_v13, %v166_v11 }
  0x97   : > { %v361_v15 = vsel %vm171_vm2, 1.0, %v538_v3  ;;  %v363_v17 = vsel %vm185_vm3, 1.0, %v538_v3 }
  0x9a   : > { %v177_v14 = vpop.permute.xlu0 %176 }
  0x9b   : > { %vm178_vm4 = vcmp.eq.s32.totalorder %v177_v14, %v166_v11 }
  0x9c   : > { %v362_v16 = vsel %vm178_vm4, 1.0, %v538_v3 }
  0x9d   : > { %v181_v18 = vadd.f32 %v362_v16, %v361_v15 }
  0x9f   : > { %v188_v19 = vadd.f32 %v363_v17, %v181_v18 }
  0xa1   : > { %v189_v20 = vpack.c.bf16 %v188_v19, %v188_v19 }
  0xa3   : > { %387 = vmatmul.mubr.msk.bf16.vlgmr.msra.gmra.mxu0 %vm218_vm5, %v189_v20 }
 0x163   : > { %v260_v21 = vpop.f32.mrf.mxu0 }
 0x164   : > { %267 = vst.msk [vmem:[%s156_s18] sm:$0xff] %vm266_vm6, %v260_v21 }
 0x165   : > { %v388_v22 = vpop.f32.mrf.mxu0 }
 0x166   : > { %471 = shalt.err (!%p468_p5)
}
 0x167   : > { %s472_s30 = scalar_lea.hbm %s634_s25, 128  ;;  %s476_s5 = scalar_lea.hbm %s682_s2, 256 }
 0x168   : > { %p473_p6 = scmp.ne.s32.totalorder %s634_s25, %s472_s30  ;;  %p477_p10 = scmp.lt.s32.totalorder %s634_s25, %s682_s2 }
 0x169   : > { %p478_p11 = scmp.lt.s32.totalorder %s476_s5, %s472_s30 }
 0x16a   : > { %p474_p7 = pnand %p473_p6, %p597_p4 }
 0x16b   : > { %p479_p12 = por %p478_p11, %p477_p10 }
 0x16c   : > { %p475_p9 = pneg %p474_p7 }
 0x16e   : > { %p480_p13 = pnand %p479_p12, %p475_p9 }
 0x170   : > { %483 = shalt.err (!%p480_p13)
}
 0x171   : > { %390 = dma.vmem_to_hbm [thread:$0]  (%p597_p4), %s636_s20, 128, %s634_s25, %s269_s26   ;;  %v263_v23 = vpop.f32.mrf.mxu0 }
 0x173   : > { %v389_v24 = vpop.f32.mrf.mxu0 }
 0x174 PF: > { %p396_p0 = scmp.ge.s32.totalorder %s534_s14, 2  ;;  %s295_s8 = sand.u32 1, %s514_s9  }
 0x175   : > { %s296_s15 = scalar_lea.sflag [#allocation3], %s295_s8 }
 0x176   : > { %p393_p1 = pnand %p396_p0, %p604_p8 }
 0x178   : > { %p394_p2 = pneg %p393_p1 }
 0x17a   : > { %509 = dma.done.wait (%p394_p2), %s296_s15, 128  }
 0x17b   : > { %511 = vsyncadd (%p394_p2), %s296_s15, 4294967168  ;;  %s15_s14 = sadd.s32 1, %s534_s14   ;;  %s685_s9 = smov %s518_s10 }
 0x17c   : > { %p12_p3 = scmp.ge.s32.totalorder %s15_s14, 4   ;;  %s686_s10 = smov %s522_s11 }
 0x17d   : > { %s687_s11 = smov %s610_s22  ;;  %s688_s12 = smov %s530_s13 }
 0x17e   : > { %s689_s13 = smov %s691_s17  ;;  %14 = sbr.rel (!%p12_p3) target bundleno = 4 (0x4), region = 63 }
 0x183   :  { %301 = vsyncpa [#allocation3], 1 }
 0x184   :  { %303 = vsyncpa [#allocation3 + $0x1], 1 }

</bundles_post_ra>
